<compile_context>
chip_gen: v7x
topology: tpu7x:2x2x1
jax: 0.10.0
libtpu: 0.0.40
codegen_flags: <defaults>
</compile_context>

<pallas_src>
import functools

import jax
import jax.numpy as jnp
from jax import lax
from jax.experimental import pallas as pl
from jax.experimental.pallas import tpu as pltpu

_LANE = 128
_MAX_TILE_ROWS = 2048      # 2048 x 128 f32 = 1 MiB per input block per buffer
_CHUNK_ROWS = 256          # inner elementwise chunk (keeps temporaries small)
_NSPLIT = 2                # leading "parallel" axis (sharded across TCs on v7x)
_SMOOTH = 1.0


def _cdiv(a, b):
    return -(-a // b)


def _round_up(x, m):
    return ((x + m - 1) // m) * m


def _bce_dice_partial_kernel(o_ref, t_ref, acc_ref, *,
                             rows, tile_rows, chunk, need_mask):
    c = pl.program_id(0)                 # split index ("parallel")
    i = pl.program_id(1)                 # step within the split ("arbitrary")
    steps = pl.num_programs(1)

    @pl.when(i == 0)
    def _init():
        acc_ref[...] = jnp.zeros_like(acc_ref)

    row0 = (c * steps + i) * tile_rows   # logical (un-clamped) first row

    def accum_chunk(start, r, masked):
        o = o_ref[pl.ds(start, r), :].astype(jnp.float32)
        t = t_ref[pl.ds(start, r), :].astype(jnp.float32)
        if masked:
            # Mask BEFORE the logs so garbage rows cannot create inf/NaN.
            rid = lax.broadcasted_iota(jnp.int32, (r, _LANE), 0)
            valid = (row0 + start + rid) < rows
            o = jnp.where(valid, o, 0.0)
            t = jnp.where(valid, t, 0.0)
        # torch.nn.BCELoss clamps the log terms at -100.  The overall sign
        # flip of the BCE sum is applied once in the wrapper.
        log_o = jnp.maximum(jnp.log(o), -100.0)
        log_1mo = jnp.maximum(jnp.log(1.0 - o), -100.0)
        bce_pos = log_1mo + t * (log_o - log_1mo)
        # Per-chunk reduction down to one (1, 128) vreg per accumulator.
        acc_ref[0, 0] += jnp.sum(t * o, axis=0, keepdims=True)
        acc_ref[0, 1] += jnp.sum(t + o, axis=0, keepdims=True)
        acc_ref[0, 2] += jnp.sum(bce_pos, axis=0, keepdims=True)

    n_chunks = tile_rows // chunk
    rem = tile_rows % chunk

    def block_body(masked):
        if n_chunks >= 2:
            def body(j, carry):
                start = pl.multiple_of(j * chunk, chunk)
                accum_chunk(start, chunk, masked)
                return carry
            lax.fori_loop(0, n_chunks, body, 0, unroll=True)
        elif n_chunks == 1:
            accum_chunk(0, chunk, masked)
        if rem:
            accum_chunk(n_chunks * chunk, rem, masked)

    if not need_mask:
        # Every grid point maps to a full block: no masking anywhere.
        block_body(masked=False)
    else:
        @pl.when(row0 + tile_rows <= rows)
        def _full():                     # unmasked fast path
            block_body(masked=False)

        @pl.when(jnp.logical_and(row0 < rows, row0 + tile_rows > rows))
        def _partial():                  # only the tail block pays for masking
            block_body(masked=True)
        # Blocks with row0 >= rows (clamped duplicates) skip compute entirely.


def _bce_terms(o, t):
    log_o = jnp.maximum(jnp.log(o), -100.0)
    log_1mo = jnp.maximum(jnp.log(1.0 - o), -100.0)
    return -(log_1mo + t * (log_o - log_1mo))


def bce_dice_loss(output, target, smooth=_SMOOTH):
    """output, target: (N, 1, H, W); output holds probabilities in [0, 1]."""
    assert output.shape == target.shape
    n = int(output.size)

    o_flat = output.reshape(-1)          # original dtype; cast happens in-kernel
    t_flat = target.reshape(-1)

    # The <128-element flat tail is handled in plain JAX (avoids a whole-array
    # pad copy of both inputs in the unaligned case).
    n_tail = n % _LANE
    n_main = n - n_tail
    if n_tail:
        o_t = o_flat[n_main:].astype(jnp.float32)
        t_t = t_flat[n_main:].astype(jnp.float32)
        tail_inter = jnp.sum(t_t * o_t)
        tail_sum_to = jnp.sum(t_t + o_t)
        tail_bce = jnp.sum(_bce_terms(o_t, t_t))
    else:
        tail_inter = tail_sum_to = tail_bce = jnp.float32(0.0)

    if n_main == 0:
        inter, sum_to, bce_sum = tail_inter, tail_sum_to, tail_bce
    else:
        rows = n_main // _LANE
        o2 = o_flat[:n_main].reshape(rows, _LANE)
        t2 = t_flat[:n_main].reshape(rows, _LANE)

        # Tiling: a single block if it fits VMEM, otherwise an even number of
        # equal blocks so the 2-way split never duplicates a DMA and both TCs
        # (on v7x) get balanced work.  On single-TC chips the split is just an
        # outer loop over distinct blocks (no wasted passes).
        if rows <= _MAX_TILE_ROWS:
            nsplit, steps, tile_rows = 1, 1, rows
        else:
            nsplit = _NSPLIT
            nblocks = nsplit * _cdiv(_cdiv(rows, _MAX_TILE_ROWS), nsplit)
            tile_rows = min(_MAX_TILE_ROWS, _round_up(_cdiv(rows, nblocks), 8))
            steps = nblocks // nsplit
        nblocks = nsplit * steps
        need_mask = nblocks * tile_rows > rows
        last_blk = _cdiv(rows, tile_rows) - 1   # clamp so DMAs stay in-bounds
        chunk = min(_CHUNK_ROWS, tile_rows)

        def in_map(c, i):
            return (jnp.minimum(c * steps + i, last_blk), 0)

        kernel = functools.partial(
            _bce_dice_partial_kernel,
            rows=rows, tile_rows=tile_rows, chunk=chunk, need_mask=need_mask)

        in_bytes = (int(jnp.dtype(o2.dtype).itemsize)
                    + int(jnp.dtype(t2.dtype).itemsize))
        cost = pl.CostEstimate(
            flops=12 * n_main,
            transcendentals=2 * n_main,
            bytes_accessed=n_main * in_bytes + nsplit * 3 * _LANE * 4)

        partials = pl.pallas_call(
            kernel,
            out_shape=jax.ShapeDtypeStruct((nsplit, 3, 1, _LANE), jnp.float32),
            grid_spec=pltpu.PrefetchScalarGridSpec(
                num_scalar_prefetch=0,
                grid=(nsplit, steps),
                in_specs=[
                    pl.BlockSpec((tile_rows, _LANE), in_map),
                    pl.BlockSpec((tile_rows, _LANE), in_map),
                ],
                out_specs=pl.BlockSpec((1, 3, 1, _LANE),
                                       lambda c, i: (c, 0, 0, 0)),
            ),
            compiler_params=pltpu.CompilerParams(
                dimension_semantics=("parallel", "arbitrary"),
                vmem_limit_bytes=32 * 1024 * 1024),
            cost_estimate=cost,
        )(o2, t2)

        # Tiny final reductions + scalar math in plain JAX.
        inter = jnp.sum(partials[:, 0]) + tail_inter
        sum_to = jnp.sum(partials[:, 1]) + tail_sum_to
        bce_sum = -jnp.sum(partials[:, 2]) + tail_bce   # sign applied here

    dice = (2.0 * inter + smooth) / (sum_to + smooth)
    return (1.0 - dice) + bce_sum / n


def _reference(output, target, smooth=_SMOOTH):
    o = output.reshape(-1).astype(jnp.float32)
    t = target.reshape(-1).astype(jnp.float32)
    inter = jnp.sum(t * o)
    dice = (2.0 * inter + smooth) / (jnp.sum(t) + jnp.sum(o) + smooth)
    log_o = jnp.maximum(jnp.log(o), -100.0)
    log_1mo = jnp.maximum(jnp.log(1.0 - o), -100.0)
    bce = jnp.mean(-(t * log_o + (1.0 - t) * log_1mo))
    return (1.0 - dice) + bce


if __name__ == "__main__":
    key = jax.random.PRNGKey(0)

    shapes = [
        (2, 1, 16, 16),      # primary small shape: lane-aligned single block
        (3, 1, 37, 41),      # unaligned total size: exercises the JAX tail path
        (2, 1, 512, 301),    # multi-block: split grid + masked partial block
    ]
    for idx, shape in enumerate(shapes):
        k1, k2 = jax.random.split(jax.random.fold_in(key, idx))
        output = jax.nn.sigmoid(jax.random.normal(k1, shape, dtype=jnp.float32))
        target = (jax.random.uniform(k2, shape) > 0.5).astype(jnp.float32)

        loss = jax.block_until_ready(bce_dice_loss(output, target))
        ref = jax.block_until_ready(_reference(output, target))
        assert jnp.allclose(loss, ref, rtol=2e-5, atol=2e-5), (shape, loss, ref)

    print("KERNEL_OK")
</pallas_src>

<mosaic_0001>
module attributes {stable_mosaic.version = 11 : i64} {
  func.func @_bce_dice_partial_kernel(%arg0: i32, %arg1: i32, %arg2: memref<4x128xf32, #tpu.memory_space<vmem>>, %arg3: memref<4x128xf32, #tpu.memory_space<vmem>>, %arg4: memref<1x3x1x128xf32, #tpu.memory_space<vmem>>) attributes {dimension_semantics = [#tpu.dimension_semantics<parallel>, #tpu.dimension_semantics<arbitrary>], iteration_bounds = array<i64: 1, 1>, scalar_prefetch = 0 : i64, scratch_operands = 0 : i64, tpu.core_type = #tpu.core_type<tc>, window_params = [{transform_indices = @transform_0, window_bounds = array<i64: 4, 128>}, {transform_indices = @transform_1, window_bounds = array<i64: 4, 128>}, {transform_indices = @transform_2, window_bounds = array<i64: 1, 3, 1, 128>}]} {
    %c0_i32 = arith.constant 0 : i32
    %0 = arith.cmpi eq, %arg1, %c0_i32 : i32
    %1 = arith.extui %0 : i1 to i32
    %c0_i32_0 = arith.constant 0 : i32
    %2 = arith.cmpi ne, %1, %c0_i32_0 : i32
    scf.if %2 {
      %cst_31 = arith.constant 0.000000e+00 : f32
      %42 = vector.broadcast %cst_31 : f32 to vector<1x3x1x128xf32>
      %c0_32 = arith.constant 0 : index
      %c0_33 = arith.constant 0 : index
      %c0_34 = arith.constant 0 : index
      %c0_35 = arith.constant 0 : index
      %43 = vector.load %arg4[%c0_32, %c0_33, %c0_34, %c0_35] : memref<1x3x1x128xf32, #tpu.memory_space<vmem>>, vector<1x3x1x128xf32>
      tpu.vector_store %arg4[%c0_32, %c0_33, %c0_34, %c0_35], %42 {strides = array<i32>} : memref<1x3x1x128xf32, #tpu.memory_space<vmem>>, vector<1x3x1x128xf32>,
    } else {
    }
    %c0 = arith.constant 0 : index
    %c0_1 = arith.constant 0 : index
    %3 = vector.load %arg2[%c0, %c0_1] : memref<4x128xf32, #tpu.memory_space<vmem>>, vector<4x128xf32>
    %c0_2 = arith.constant 0 : index
    %c0_3 = arith.constant 0 : index
    %4 = vector.load %arg3[%c0_2, %c0_3] : memref<4x128xf32, #tpu.memory_space<vmem>>, vector<4x128xf32>
    %5 = math.log %3 : vector<4x128xf32>
    %cst = arith.constant -1.000000e+02 : f32
    %6 = vector.broadcast %cst : f32 to vector<4x128xf32>
    %7 = arith.maximumf %5, %6 : vector<4x128xf32>
    %cst_4 = arith.constant 1.000000e+00 : f32
    %8 = vector.broadcast %cst_4 : f32 to vector<4x128xf32>
    %9 = arith.subf %8, %3 : vector<4x128xf32>
    %10 = math.log %9 : vector<4x128xf32>
    %cst_5 = arith.constant -1.000000e+02 : f32
    %11 = vector.broadcast %cst_5 : f32 to vector<4x128xf32>
    %12 = arith.maximumf %10, %11 : vector<4x128xf32>
    %13 = arith.subf %7, %12 : vector<4x128xf32>
    %14 = arith.mulf %4, %13 : vector<4x128xf32>
    %15 = arith.addf %12, %14 : vector<4x128xf32>
    %c0_6 = arith.constant 0 : index
    %c0_7 = arith.constant 0 : index
    %c0_8 = arith.constant 0 : index
    %c0_9 = arith.constant 0 : index
    %16 = vector.load %arg4[%c0_6, %c0_7, %c0_8, %c0_9] : memref<1x3x1x128xf32, #tpu.memory_space<vmem>>, vector<1x1x1x128xf32>
    %17 = vector.shape_cast %16 : vector<1x1x1x128xf32> to vector<1x128xf32>
    %18 = arith.mulf %4, %3 : vector<4x128xf32>
    %cst_10 = arith.constant dense<0.000000e+00> : vector<128xf32>
    %19 = vector.multi_reduction <add>, %18, %cst_10 [0] : vector<4x128xf32> to vector<128xf32>
    %20 = vector.shape_cast %19 : vector<128xf32> to vector<1x128xf32>
    %21 = arith.addf %17, %20 : vector<1x128xf32>
    %c0_11 = arith.constant 0 : index
    %c0_12 = arith.constant 0 : index
    %c0_13 = arith.constant 0 : index
    %c0_14 = arith.constant 0 : index
    %22 = vector.load %arg4[%c0_11, %c0_12, %c0_13, %c0_14] : memref<1x3x1x128xf32, #tpu.memory_space<vmem>>, vector<1x1x1x128xf32>
    %23 = vector.shape_cast %22 : vector<1x1x1x128xf32> to vector<1x128xf32>
    %24 = vector.shape_cast %21 : vector<1x128xf32> to vector<1x1x1x128xf32>
    tpu.vector_store %arg4[%c0_11, %c0_12, %c0_13, %c0_14], %24 {strides = array<i32>} : memref<1x3x1x128xf32, #tpu.memory_space<vmem>>, vector<1x1x1x128xf32>,
    %c0_15 = arith.constant 0 : index
    %c1 = arith.constant 1 : index
    %c0_16 = arith.constant 0 : index
    %c0_17 = arith.constant 0 : index
    %25 = vector.load %arg4[%c0_15, %c1, %c0_16, %c0_17] : memref<1x3x1x128xf32, #tpu.memory_space<vmem>>, vector<1x1x1x128xf32>
    %26 = vector.shape_cast %25 : vector<1x1x1x128xf32> to vector<1x128xf32>
    %27 = arith.addf %4, %3 : vector<4x128xf32>
    %cst_18 = arith.constant dense<0.000000e+00> : vector<128xf32>
    %28 = vector.multi_reduction <add>, %27, %cst_18 [0] : vector<4x128xf32> to vector<128xf32>
    %29 = vector.shape_cast %28 : vector<128xf32> to vector<1x128xf32>
    %30 = arith.addf %26, %29 : vector<1x128xf32>
    %c0_19 = arith.constant 0 : index
    %c1_20 = arith.constant 1 : index
    %c0_21 = arith.constant 0 : index
    %c0_22 = arith.constant 0 : index
    %31 = vector.load %arg4[%c0_19, %c1_20, %c0_21, %c0_22] : memref<1x3x1x128xf32, #tpu.memory_space<vmem>>, vector<1x1x1x128xf32>
    %32 = vector.shape_cast %31 : vector<1x1x1x128xf32> to vector<1x128xf32>
    %33 = vector.shape_cast %30 : vector<1x128xf32> to vector<1x1x1x128xf32>
    tpu.vector_store %arg4[%c0_19, %c1_20, %c0_21, %c0_22], %33 {strides = array<i32>} : memref<1x3x1x128xf32, #tpu.memory_space<vmem>>, vector<1x1x1x128xf32>,
    %c0_23 = arith.constant 0 : index
    %c2 = arith.constant 2 : index
    %c0_24 = arith.constant 0 : index
    %c0_25 = arith.constant 0 : index
    %34 = vector.load %arg4[%c0_23, %c2, %c0_24, %c0_25] : memref<1x3x1x128xf32, #tpu.memory_space<vmem>>, vector<1x1x1x128xf32>
    %35 = vector.shape_cast %34 : vector<1x1x1x128xf32> to vector<1x128xf32>
    %cst_26 = arith.constant dense<0.000000e+00> : vector<128xf32>
    %36 = vector.multi_reduction <add>, %15, %cst_26 [0] : vector<4x128xf32> to vector<128xf32>
    %37 = vector.shape_cast %36 : vector<128xf32> to vector<1x128xf32>
    %38 = arith.addf %35, %37 : vector<1x128xf32>
    %c0_27 = arith.constant 0 : index
    %c2_28 = arith.constant 2 : index
    %c0_29 = arith.constant 0 : index
    %c0_30 = arith.constant 0 : index
    %39 = vector.load %arg4[%c0_27, %c2_28, %c0_29, %c0_30] : memref<1x3x1x128xf32, #tpu.memory_space<vmem>>, vector<1x1x1x128xf32>
    %40 = vector.shape_cast %39 : vector<1x1x1x128xf32> to vector<1x128xf32>
    %41 = vector.shape_cast %38 : vector<1x128xf32> to vector<1x1x1x128xf32>
    tpu.vector_store %arg4[%c0_27, %c2_28, %c0_29, %c0_30], %41 {strides = array<i32>} : memref<1x3x1x128xf32, #tpu.memory_space<vmem>>, vector<1x1x1x128xf32>,
    return
  }
  func.func @transform_0(%arg0: i32, %arg1: i32) -> (i32, i32) {
    %c1_i32 = arith.constant 1 : i32
    %0 = arith.muli %arg0, %c1_i32 : i32
    %1 = arith.addi %0, %arg1 : i32
    %c0_i32 = arith.constant 0 : i32
    %2 = arith.minsi %1, %c0_i32 : i32
    %c0_i32_0 = arith.constant 0 : i32
    %c0_i32_1 = arith.constant 0 : i32
    return %2, %c0_i32_0 : i32, i32
  }
  func.func @transform_1(%arg0: i32, %arg1: i32) -> (i32, i32) {
    %c1_i32 = arith.constant 1 : i32
    %0 = arith.muli %arg0, %c1_i32 : i32
    %1 = arith.addi %0, %arg1 : i32
    %c0_i32 = arith.constant 0 : i32
    %2 = arith.minsi %1, %c0_i32 : i32
    %c0_i32_0 = arith.constant 0 : i32
    %c0_i32_1 = arith.constant 0 : i32
    return %2, %c0_i32_0 : i32, i32
  }
  func.func @transform_2(%arg0: i32, %arg1: i32) -> (i32, i32, i32, i32) {
    %c0_i32 = arith.constant 0 : i32
    %c0_i32_0 = arith.constant 0 : i32
    %c0_i32_1 = arith.constant 0 : i32
    %c0_i32_2 = arith.constant 0 : i32
    return %arg0, %c0_i32, %c0_i32_0, %c0_i32_1 : i32, i32, i32, i32
  }
}

</mosaic_0001>

<bundles_post_ra>
// kernel: tpu_custom_call.1
= control target key start
LH: loop header
LB: loop body
LE: loop exit
PB: predicated region body
PF: predicated region fallthrough
CT: control target
= control target key end

     0   :  { %7 = vsyncpa [#allocation3], 0  ;;  %s270_s0 = inlined_call_operand.hbm [shape: f32[4,128], index: 0, kind: input, shape index: {}]   ;;  %s271_s1 = inlined_call_operand.hbm [shape: f32[4,128], index: 1, kind: input, shape index: {}]   ;;  %s272_s2 = inlined_call_operand.hbm [shape: f32[1,3,1,128], index: 2, kind: output, shape index: {}]  }
   0x1   :  { %8 = vsyncpa [#allocation6], 0 }
   0x2   :  { %9 = vsyncpa [#allocation4], 0  ;;  %s210_s9 = smov [#allocation2]   ;;  %s211_s11 = smov [#allocation5]  }
   0x3   :  { %s21_s10 = sshll.u32 %s210_s9, 4  ;;  %s36_s12 = sshll.u32 %s211_s11, 4  ;;  %s22_s10 = int_to_ptr.vmem [resolvable:$true] %s21_s10  ;;  %s37_s12 = int_to_ptr.vmem [resolvable:$true] %s36_s12 }
   0x4   :  { %s138_s15 = scalar_lea.hbm %s270_s0, 64 }
   0x5   :  { %p139_p0 = scmp.ne.s32.totalorder %s270_s0, %s138_s15  ;;  %p142_p1 = scmp.lt.u32.totalorder %s138_s15, %s270_s0 }
   0x7   :  { %p144_p2 = pnand %p142_p1, %p139_p0 }
   0x9   :  { %147 = shalt.err (!%p144_p2)
}
   0xa   :  { %s148_s20 = scalar_lea.vmem %s22_s10, 64  ;;  %p153_p4 = scmp.lt.s32.totalorder %s22_s10, %s22_s10 }
   0xb   :  { %p149_p3 = scmp.ne.s32.totalorder %s22_s10, %s148_s20  ;;  %p154_p5 = scmp.lt.s32.totalorder %s148_s20, %s148_s20 }
   0xd   :  { %p155_p6 = por %p154_p5, %p153_p4 }
   0xf   :  { %p156_p7 = pnand %p155_p6, %p149_p3 }
  0x11   :  { %159 = shalt.err (!%p156_p7)
}
  0x12   :  { %24 = dma.hbm_to_vmem [thread:$0]  %s270_s0, 64, %s22_s10, [#allocation3]  }
  0x13   :  { %s160_s25 = scalar_lea.hbm %s271_s1, 64 }
  0x14   :  { %p161_p8 = scmp.ne.s32.totalorder %s271_s1, %s160_s25  ;;  %p164_p9 = scmp.lt.u32.totalorder %s160_s25, %s271_s1 }
  0x16   :  { %p166_p10 = pnand %p164_p9, %p161_p8 }
  0x18   :  { %169 = shalt.err (!%p166_p10)
}
  0x19   :  { %s170_s30 = scalar_lea.vmem %s37_s12, 64  ;;  %p175_p12 = scmp.lt.s32.totalorder %s37_s12, %s37_s12 }
  0x1a   :  { %p171_p11 = scmp.ne.s32.totalorder %s37_s12, %s170_s30  ;;  %p176_p13 = scmp.lt.s32.totalorder %s170_s30, %s170_s30 }
  0x1c   :  { %p177_p0 = por %p176_p13, %p175_p12 }
  0x1e   :  { %p178_p1 = pnand %p177_p0, %p171_p11 }
  0x20   :  { %181 = shalt.err (!%p178_p1)
}
  0x21   :  { %39 = dma.hbm_to_vmem [thread:$0]  %s271_s1, 64, %s37_s12, [#allocation6]  }
  0x22   :  { %204 = dma.done.wait [#allocation3], 64  }
  0x23   :  { %205 = vsyncadd [#allocation3], 4294967232 }
  0x24   :  { %206 = dma.done.wait [#allocation6], 64  }
  0x25   :  { %207 = vsyncadd [#allocation6], 4294967232  ;;  %v212_v0 = vmov 0.0   ;;  %v59_v1 = vld [vmem:[#allocation2] sm:$0xf]  ;;  %vm73_vm0 = vcmask 1043456  }
  0x26   :  { %56 = vst [vmem:[#allocation7] sm:$0x1] %v212_v0  ;;  %57 = vst [vmem:[#allocation7 + $0x1] sm:$0x1] %v212_v0  ;;  %v60_v2 = vld [vmem:[#allocation5] sm:$0xf]  ;;  %134 = vlog2.f32 %v59_v1 }
  0x27   :  { %58 = vst [vmem:[#allocation7 + $0x2] sm:$0x1] %v212_v0  ;;  %v72_v3 = vmul.f32 %v60_v2, %v59_v1  ;;  %v85_v4 = vadd.f32 %v60_v2, %v59_v1  ;;  %v64_v5 = vsub.f32 1.0, %v59_v1  ;;  %s213_s1 = smov [#allocation7]  }
  0x28   :  { %s111_s4 = sshll.u32 %s213_s1, 4  ;;  %s112_s4 = int_to_ptr.vmem [resolvable:$true] %s111_s4 }
  0x29   :  { %v74_v6 = vsel %vm73_vm0, %v72_v3, 0.0  ;;  %v86_v7 = vsel %vm73_vm0, %v85_v4, 0.0  ;;  %136 = vlog2.f32 %v64_v5  ;;  %s182_s5 = scalar_lea.vmem %s112_s4, 48  ;;  %s186_s6 = scalar_lea.vmem %s112_s4, 64 }
  0x2a   :  { %v75_v8 = vrot.slane %v74_v6, 4  ;;  %v87_v9 = vrot.slane %v86_v7, 4  ;;  %p183_p2 = scmp.ne.s32.totalorder %s112_s4, %s182_s5  ;;  %p187_p3 = scmp.lt.s32.totalorder %s112_s4, %s112_s4 }
  0x2b   :  { %p188_p4 = scmp.lt.s32.totalorder %s186_s6, %s182_s5 }
  0x2c   :  { %v76_v10 = vadd.f32 %v75_v8, %v74_v6  ;;  %v88_v11 = vadd.f32 %v87_v9, %v86_v7 }
  0x2d   :  { %v71_v21 = vld [vmem:[#allocation7] sm:$0x1]  ;;  %v84_v22 = vld [vmem:[#allocation7 + $0x1] sm:$0x1]  ;;  %p189_p5 = por %p188_p4, %p187_p3 }
  0x2e   :  { %v77_v12 = vrot.slane %v76_v10, 2  ;;  %v89_v13 = vrot.slane %v88_v11, 2  ;;  %v96_v39 = vld [vmem:[#allocation7 + $0x2] sm:$0x1] }
  0x2f   :  { %p190_p6 = pnand %p189_p5, %p183_p2 }
  0x30   :  { %v78_v14 = vadd.f32 %v77_v12, %v76_v10  ;;  %v90_v15 = vadd.f32 %v89_v13, %v88_v11  ;;  %v135_v16 = vpop.eup %134 }
  0x31   :  { %v62_v19 = vmul.f32 0.6931472, %v135_v16 }
  0x32   :  { %v79_v17 = vrot.slane %v78_v14, 1  ;;  %v91_v18 = vrot.slane %v90_v15, 1 }
  0x33   :  { %v137_v20 = vpop.eup %136  ;;  %v63_v25 = vmax.f32 %v62_v19, -100.0 }
  0x34   :  { %v80_v23 = vadd.f32 %v79_v17, %v78_v14  ;;  %v92_v24 = vadd.f32 %v91_v18, %v90_v15  ;;  %v66_v26 = vmul.f32 0.6931472, %v137_v20 }
  0x36   :  { %v81_v27 = vadd.f32 %v80_v23, %v71_v21  ;;  %v93_v28 = vadd.f32 %v92_v24, %v84_v22  ;;  %v67_v29 = vmax.f32 %v66_v26, -100.0 }
  0x38   :  { %82 = vst [vmem:[#allocation7] sm:$0x1] %v81_v27  ;;  %94 = vst [vmem:[#allocation7 + $0x1] sm:$0x1] %v93_v28  ;;  %v68_v30 = vsub.f32 %v63_v25, %v67_v29 }
  0x3a   :  { %v69_v31 = vmul.f32 %v68_v30, %v60_v2 }
  0x3c   :  { %v70_v32 = vadd.f32 %v69_v31, %v67_v29 }
  0x3e   :  { %v97_v33 = vsel %vm73_vm0, %v70_v32, 0.0 }
  0x3f   :  { %v98_v34 = vrot.slane %v97_v33, 4 }
  0x41   :  { %v99_v35 = vadd.f32 %v98_v34, %v97_v33 }
  0x43   :  { %v100_v36 = vrot.slane %v99_v35, 2 }
  0x45   :  { %v101_v37 = vadd.f32 %v100_v36, %v99_v35 }
  0x47   :  { %v102_v38 = vrot.slane %v101_v37, 1 }
  0x49   :  { %v103_v40 = vadd.f32 %v102_v38, %v101_v37 }
  0x4b   :  { %v104_v41 = vadd.f32 %v103_v40, %v96_v39 }
  0x4d   :  { %105 = vst [vmem:[#allocation7 + $0x2] sm:$0x1] %v104_v41 }
  0x4e   :  { %193 = shalt.err (!%p190_p6)
}
  0x4f   :  { %s194_s9 = scalar_lea.hbm %s272_s2, 48 }
  0x50   :  { %p195_p7 = scmp.ne.s32.totalorder %s272_s2, %s194_s9  ;;  %p198_p8 = scmp.lt.u32.totalorder %s194_s9, %s272_s2 }
  0x52   :  { %p200_p9 = pnand %p198_p8, %p195_p7 }
  0x54   :  { %203 = shalt.err (!%p200_p9)
}
  0x55   :  { %s214_s14 = smov 16   ;;  %s215_s15 = smov 1  }
  0x56   :  { %117 = dma.vmem_to_hbm [thread:$0]  %s112_s4, 48, %s272_s2, [#allocation4], %s214_s14, %s214_s14, %s215_s15  }
  0x57   :  { %208 = dma.done.wait [#allocation4], 48  }
  0x58   :  { %209 = vsyncadd [#allocation4], 4294967248 }
  0x59   :  { %121 = vsyncpa [#allocation3], 1 }
  0x5a   :  { %122 = vsyncpa [#allocation6], 1 }
  0x5b   :  { %123 = vsyncpa [#allocation4], 1 }

</bundles_post_ra>
